<compile_context>
chip_gen: v6e
topology: v6e:2x2x1
jax: 0.10.0
libtpu: 0.0.40
codegen_flags: <defaults>
</compile_context>

<pallas_src>
import functools
import math

import jax
import jax.numpy as jnp
from jax.experimental import pallas as pl
from jax.experimental.pallas import tpu as pltpu


def _round_up(a: int, b: int) -> int:
    return ((a + b - 1) // b) * b


def _ntp_linear_kernel(x_ref, w_ref, b_ref, o_ref, acc_ref, *,
                       scale: float, k_rem: int, compute_dtype):
    k = pl.program_id(2)
    nk = pl.num_programs(2)

    x = x_ref[...]
    w = w_ref[...]

    if k_rem:
        # Zero the K tail of the last (partial) K block.  Both operands are
        # masked so undefined data (possibly NaN/Inf) past K never reaches
        # the MXU accumulation.
        lim = jnp.where(k == nk - 1, k_rem, x.shape[-1])
        x = jnp.where(
            jax.lax.broadcasted_iota(jnp.int32, x.shape, 1) < lim, x, 0)
        w = jnp.where(
            jax.lax.broadcasted_iota(jnp.int32, w.shape, 0) < lim, w, 0)

    if compute_dtype is not None:
        x = x.astype(compute_dtype)
        w = w.astype(compute_dtype)

    prod = jnp.dot(x, w, preferred_element_type=jnp.float32)

    @pl.when(k == 0)
    def _():
        acc_ref[...] = prod          # direct write: no zero-init store/load

    @pl.when(k != 0)
    def _():
        acc_ref[...] += prod

    @pl.when(k == nk - 1)
    def _():
        o_ref[...] = (
            scale * acc_ref[...] + b_ref[...].astype(jnp.float32)
        ).astype(o_ref.dtype)


def ntp_linear(x: jax.Array, weight: jax.Array, bias: jax.Array, *,
               compute_dtype=None) -> jax.Array:
    """Pallas TPU implementation of NTPLinear.forward.

    x: (M, K), weight: (K, N), bias: (1, N) -> (M, N)
    """
    M, K = x.shape
    K2, N = weight.shape
    assert K == K2, "x / weight contraction dims must match"
    assert bias.shape == (1, N), "bias must have shape (1, out_features)"

    scale = 1.0 / math.sqrt(K)

    # Sublane multiple by dtype (assert on supported dtypes, no silent default).
    if x.dtype == jnp.float32:
        sub = 8
    elif x.dtype == jnp.bfloat16:
        sub = 16
    elif jnp.dtype(x.dtype).itemsize == 1:
        sub = 32
    else:
        raise ValueError(f"unsupported input dtype: {x.dtype}")

    # Generation-aware tile caps (v5e/v6e: 128 MiB VMEM, 1 TC; v7x: 64 MiB, 2 TC).
    try:
        vmem_cap = int(pltpu.get_tpu_info().vmem_capacity_bytes)
    except Exception:
        vmem_cap = 64 << 20  # conservative fallback
    if vmem_cap >= (100 << 20):          # v5e / v6e class
        tm_cap, tn_cap, tk_cap = 1024, 1024, 1024
        two_tc = False
    else:                                # v7x class (halved VMEM, 2 TCs)
        tm_cap, tn_cap, tk_cap = 512, 1024, 1024
        two_tc = True

    tm = min(tm_cap, _round_up(M, sub))
    tn = min(tn_cap, _round_up(N, 128))
    tk = min(tk_cap, _round_up(K, 128))

    grid_m, grid_n = pl.cdiv(M, tm), pl.cdiv(N, tn)
    if two_tc and grid_m == 1 and grid_n == 1:
        # Expose >= 2 blocks along a parallel axis so both TensorCores work.
        if N > 128:
            tn = _round_up(-(-N // 2), 128)
        elif M > sub:
            tm = _round_up(-(-M // 2), sub)
        grid_m, grid_n = pl.cdiv(M, tm), pl.cdiv(N, tn)
    grid_k = pl.cdiv(K, tk)
    k_rem = K % tk  # 0 => no in-kernel K-tail masking needed

    isize = jnp.dtype(x.dtype).itemsize
    osize = isize

    # Raise the scoped VMEM limit to cover the double-buffered tiles + acc.
    buf_bytes = (2 * isize * (tm * tk + tk * tn)   # x, w (double buffered)
                 + 2 * osize * tm * tn             # out  (double buffered)
                 + 4 * tm * tn                     # f32 accumulator
                 + 2 * isize * tn)                 # bias
    vmem_limit = int(min(0.9 * vmem_cap, 1.25 * buf_bytes + (8 << 20)))
    vmem_limit = max(vmem_limit, 32 << 20)

    # Actual HBM traffic: x re-read per output-column tile, w per row tile.
    bytes_accessed = int(isize * (M * K * grid_n + K * N * grid_m + N)
                         + osize * M * N)

    kernel = functools.partial(
        _ntp_linear_kernel, scale=scale, k_rem=k_rem,
        compute_dtype=compute_dtype)

    return pl.pallas_call(
        kernel,
        out_shape=jax.ShapeDtypeStruct((M, N), x.dtype),
        grid_spec=pltpu.PrefetchScalarGridSpec(
            num_scalar_prefetch=0,
            grid=(grid_m, grid_n, grid_k),
            in_specs=[
                pl.BlockSpec((tm, tk), lambda i, j, k: (i, k)),
                pl.BlockSpec((tk, tn), lambda i, j, k: (k, j)),
                # Bias only follows the output-column axis (no re-DMA over i/k).
                pl.BlockSpec((1, tn), lambda i, j, k: (0, j)),
            ],
            out_specs=pl.BlockSpec((tm, tn), lambda i, j, k: (i, j)),
            scratch_shapes=[pltpu.VMEM((tm, tn), jnp.float32)],
        ),
        compiler_params=pltpu.CompilerParams(
            dimension_semantics=("parallel", "parallel", "arbitrary"),
            vmem_limit_bytes=vmem_limit,
        ),
        cost_estimate=pl.CostEstimate(
            flops=2 * M * N * K,
            transcendentals=0,
            bytes_accessed=bytes_accessed,
        ),
    )(x, weight, bias)


if __name__ == "__main__":
    # Small shapes consistent with the module: batch=8, in_features=32,
    # out_features=48 (non-multiples of 128 exercise boundary masking and the
    # in-kernel K-tail mask).
    batch, in_features, out_features = 8, 32, 48
    key = jax.random.PRNGKey(0)
    kx, kw, kb = jax.random.split(key, 3)

    x = jax.random.normal(kx, (batch, in_features), dtype=jnp.float32)
    weight = jax.random.normal(kw, (in_features, out_features), dtype=jnp.float32)
    bias = jax.random.normal(kb, (1, out_features), dtype=jnp.float32)

    out = ntp_linear(x, weight, bias)
    out = jax.block_until_ready(out)

    ref = (1.0 / math.sqrt(in_features)) * jnp.dot(
        x, weight, precision=jax.lax.Precision.HIGHEST
    ) + bias

    assert out.shape == ref.shape
    assert jnp.allclose(out, ref, atol=1e-4, rtol=1e-4), (
        float(jnp.max(jnp.abs(out - ref)))
    )
    print("KERNEL_OK")
</pallas_src>

<mosaic_0001>
module attributes {stable_mosaic.version = 11 : i64} {
  func.func @_ntp_linear_kernel(%arg0: i32, %arg1: i32, %arg2: i32, %arg3: memref<8x128xf32, #tpu.memory_space<vmem>>, %arg4: memref<128x128xf32, #tpu.memory_space<vmem>>, %arg5: memref<1x128xf32, #tpu.memory_space<vmem>>, %arg6: memref<8x128xf32, #tpu.memory_space<vmem>>, %arg7: memref<8x128xf32, #tpu.memory_space<vmem>>) attributes {dimension_semantics = [#tpu.dimension_semantics<parallel>, #tpu.dimension_semantics<parallel>, #tpu.dimension_semantics<arbitrary>], iteration_bounds = array<i64: 1, 1, 1>, scalar_prefetch = 0 : i64, scratch_operands = 1 : i64, tpu.core_type = #tpu.core_type<tc>, window_params = [{transform_indices = @transform_0, window_bounds = array<i64: 8, 128>}, {transform_indices = @transform_1, window_bounds = array<i64: 128, 128>}, {transform_indices = @transform_2, window_bounds = array<i64: 1, 128>}, {transform_indices = @transform_3, window_bounds = array<i64: 8, 128>}]} {
    %c0 = arith.constant 0 : index
    %c0_0 = arith.constant 0 : index
    %0 = vector.load %arg3[%c0, %c0_0] : memref<8x128xf32, #tpu.memory_space<vmem>>, vector<8x128xf32>
    %c0_1 = arith.constant 0 : index
    %c0_2 = arith.constant 0 : index
    %1 = vector.load %arg4[%c0_1, %c0_2] : memref<128x128xf32, #tpu.memory_space<vmem>>, vector<128x128xf32>
    %c0_i32 = arith.constant 0 : i32
    %2 = arith.cmpi eq, %arg2, %c0_i32 : i32
    %c32_i32 = arith.constant 32 : i32
    %c128_i32 = arith.constant 128 : i32
    %3 = arith.select %2, %c32_i32, %c128_i32 : i32
    %4 = tpu.iota {dimensions = array<i32: 1>} : vector<8x128xi32>
    %5 = vector.broadcast %3 : i32 to vector<8x128xi32>
    %6 = arith.cmpi slt, %4, %5 : vector<8x128xi32>
    %c0_i32_3 = arith.constant 0 : i32
    %7 = arith.sitofp %c0_i32_3 : i32 to f32
    %8 = vector.broadcast %7 : f32 to vector<8x128xf32>
    %9 = arith.select %6, %0, %8 : vector<8x128xi1>, vector<8x128xf32>
    %10 = tpu.iota {dimensions = array<i32: 0>} : vector<128x128xi32>
    %11 = vector.broadcast %3 : i32 to vector<128x128xi32>
    %12 = arith.cmpi slt, %10, %11 : vector<128x128xi32>
    %c0_i32_4 = arith.constant 0 : i32
    %13 = arith.sitofp %c0_i32_4 : i32 to f32
    %14 = vector.broadcast %13 : f32 to vector<128x128xf32>
    %15 = arith.select %12, %1, %14 : vector<128x128xi1>, vector<128x128xf32>
    %cst = arith.constant dense<0.000000e+00> : vector<8x128xf32>
    %16 = tpu.matmul %9, %15, %cst {dimension_numbers = #tpu.dot_dimension_numbers<[1], [0], [0], [1], [0, 0, 1, 1], [], []>} : vector<8x128xf32>, vector<128x128xf32>, vector<8x128xf32> -> vector<8x128xf32>
    %c0_i32_5 = arith.constant 0 : i32
    %17 = arith.cmpi eq, %arg2, %c0_i32_5 : i32
    %18 = arith.extui %17 : i1 to i32
    %c0_i32_6 = arith.constant 0 : i32
    %19 = arith.cmpi ne, %18, %c0_i32_6 : i32
    scf.if %19 {
      %c0_11 = arith.constant 0 : index
      %c0_12 = arith.constant 0 : index
      %26 = vector.load %arg7[%c0_11, %c0_12] : memref<8x128xf32, #tpu.memory_space<vmem>>, vector<8x128xf32>
      tpu.vector_store %arg7[%c0_11, %c0_12], %16 {strides = array<i32>} : memref<8x128xf32, #tpu.memory_space<vmem>>, vector<8x128xf32>,
    } else {
    }
    %c0_i32_7 = arith.constant 0 : i32
    %20 = arith.cmpi ne, %arg2, %c0_i32_7 : i32
    %21 = arith.extui %20 : i1 to i32
    %c0_i32_8 = arith.constant 0 : i32
    %22 = arith.cmpi ne, %21, %c0_i32_8 : i32
    scf.if %22 {
      %c0_11 = arith.constant 0 : index
      %c0_12 = arith.constant 0 : index
      %26 = vector.load %arg7[%c0_11, %c0_12] : memref<8x128xf32, #tpu.memory_space<vmem>>, vector<8x128xf32>
      %27 = arith.addf %26, %16 : vector<8x128xf32>
      %c0_13 = arith.constant 0 : index
      %c0_14 = arith.constant 0 : index
      %28 = vector.load %arg7[%c0_13, %c0_14] : memref<8x128xf32, #tpu.memory_space<vmem>>, vector<8x128xf32>
      tpu.vector_store %arg7[%c0_13, %c0_14], %27 {strides = array<i32>} : memref<8x128xf32, #tpu.memory_space<vmem>>, vector<8x128xf32>,
    } else {
    }
    %c0_i32_9 = arith.constant 0 : i32
    %23 = arith.cmpi eq, %arg2, %c0_i32_9 : i32
    %24 = arith.extui %23 : i1 to i32
    %c0_i32_10 = arith.constant 0 : i32
    %25 = arith.cmpi ne, %24, %c0_i32_10 : i32
    scf.if %25 {
      %c0_11 = arith.constant 0 : index
      %c0_12 = arith.constant 0 : index
      %26 = vector.load %arg7[%c0_11, %c0_12] : memref<8x128xf32, #tpu.memory_space<vmem>>, vector<8x128xf32>
      %cst_13 = arith.constant 0.176776692 : f32
      %27 = vector.broadcast %cst_13 : f32 to vector<8x128xf32>
      %28 = arith.mulf %27, %26 : vector<8x128xf32>
      %c0_14 = arith.constant 0 : index
      %c0_15 = arith.constant 0 : index
      %29 = vector.load %arg5[%c0_14, %c0_15] : memref<1x128xf32, #tpu.memory_space<vmem>>, vector<1x128xf32>
      %30 = vector.broadcast %29 : vector<1x128xf32> to vector<8x128xf32>
      %31 = arith.addf %28, %30 : vector<8x128xf32>
      %c0_16 = arith.constant 0 : index
      %c0_17 = arith.constant 0 : index
      %32 = vector.load %arg6[%c0_16, %c0_17] : memref<8x128xf32, #tpu.memory_space<vmem>>, vector<8x128xf32>
      tpu.vector_store %arg6[%c0_16, %c0_17], %31 {strides = array<i32>} : memref<8x128xf32, #tpu.memory_space<vmem>>, vector<8x128xf32>,
    } else {
    }
    return
  }
  func.func @transform_0(%arg0: i32, %arg1: i32, %arg2: i32) -> (i32, i32) {
    %c0_i32 = arith.constant 0 : i32
    return %arg0, %arg2 : i32, i32
  }
  func.func @transform_1(%arg0: i32, %arg1: i32, %arg2: i32) -> (i32, i32) {
    %c0_i32 = arith.constant 0 : i32
    return %arg2, %arg1 : i32, i32
  }
  func.func @transform_2(%arg0: i32, %arg1: i32, %arg2: i32) -> (i32, i32) {
    %c0_i32 = arith.constant 0 : i32
    %c0_i32_0 = arith.constant 0 : i32
    return %c0_i32, %arg1 : i32, i32
  }
  func.func @transform_3(%arg0: i32, %arg1: i32, %arg2: i32) -> (i32, i32) {
    %c0_i32 = arith.constant 0 : i32
    return %arg0, %arg1 : i32, i32
  }
}

</mosaic_0001>

<bundles_post_ra>
// kernel: tpu_custom_call.1
= control target key start
LH: loop header
LB: loop body
LE: loop exit
PB: predicated region body
PF: predicated region fallthrough
CT: control target
= control target key end

     0   :  { %8 = vsyncpa [#allocation4], 0  ;;  %s355_s0 = inlined_call_operand.hbm [shape: f32[8,32], index: 0, kind: input, shape index: {}]   ;;  %s356_s1 = inlined_call_operand.hbm [shape: f32[32,48], index: 1, kind: input, shape index: {}]   ;;  %s357_s2 = inlined_call_operand.vmem [shape: f32[1,48], index: 2, kind: input, shape index: {}]   ;;  %s358_s3 = inlined_call_operand.hbm [shape: f32[8,48], index: 3, kind: output, shape index: {}]  }
   0x1   :  { %9 = vsyncpa [#allocation7], 0 }
   0x2   :  { %10 = vsyncpa [#allocation5], 0  ;;  %s316_s12 = smov [#allocation3]  }
   0x3   :  { %s17_s13 = sshll.u32 %s316_s12, 4  ;;  %s18_s13 = int_to_ptr.vmem [resolvable:$true] %s17_s13 }
   0x4   :  { %s258_s14 = scalar_lea.vmem %s18_s13, 128  ;;  %p263_p1 = scmp.lt.s32.totalorder %s18_s13, %s18_s13 }
   0x5   :  { %p259_p0 = scmp.ne.s32.totalorder %s18_s13, %s258_s14  ;;  %p264_p2 = scmp.lt.s32.totalorder %s258_s14, %s258_s14 }
   0x7   :  { %p265_p3 = por %p264_p2, %p263_p1 }
   0x9   :  { %p266_p4 = pnand %p265_p3, %p259_p0 }
   0xb   :  { %269 = shalt.err (!%p266_p4)
}
   0xc   :  { %20 = dma.hbm_to_vmem [thread:$0]  %s355_s0, 128, %s18_s13, [#allocation4]  }
   0xd   :  { %25 = vsyncadd [#allocation7], 1536  ;;  %s317_s17 = smov [#allocation6]  }
   0xe   :  { %s26_s18 = sshll.u32 %s317_s17, 4  ;;  %s27_s18 = int_to_ptr.vmem [resolvable:$true] %s26_s18 }
   0xf   :  { %s278_s19 = scalar_lea.vmem %s27_s18, 512  ;;  %s282_s20 = scalar_lea.vmem %s27_s18, 2048 }
  0x10   :  { %p279_p5 = scmp.ne.s32.totalorder %s27_s18, %s278_s19  ;;  %p283_p6 = scmp.lt.s32.totalorder %s27_s18, %s27_s18 }
  0x11   :  { %p284_p7 = scmp.lt.s32.totalorder %s282_s20, %s278_s19 }
  0x13   :  { %p285_p8 = por %p284_p7, %p283_p6 }
  0x15   :  { %p286_p9 = pnand %p285_p8, %p279_p5 }
  0x17   :  { %289 = shalt.err (!%p286_p9)
}
  0x18   :  { %s318_s21 = smov 128   ;;  %s319_s22 = smov 8  }
  0x19   :  { %32 = dma.hbm_to_vmem [thread:$0]  %s356_s1, 512, %s27_s18, [#allocation7], %s318_s21, %s318_s21, %s319_s22  }
  0x1a   :  { %310 = dma.done.wait [#allocation4], 128  }
  0x1b   :  { %311 = vsyncadd [#allocation4], 4294967168 }
  0x1c   :  { %312 = dma.done.wait [#allocation7], 2048  }
  0x1d   :  { %313 = vsyncadd [#allocation7], 4294965248  ;;  %v320_v0 = vmov 0.0   ;;  %vm321_vm0 = vmmov 0   ;;  %v60_v1 = vlaneseq  ;;  %v45_v2 = vld [vmem:[#allocation6 + $0x18] sm:$0xff]  ;;  %v44_v3 = vld [vmem:[#allocation6 + $0x10] sm:$0xff] }
  0x1e   :  { %232 = vmatprep.subr.mxu0 %v320_v0  ;;  %240 = vmatprep.mubr.msk.f32.mxu0 %vm321_vm0, %v320_v0  ;;  %v43_v5 = vld [vmem:[#allocation6 + $0x8] sm:$0xff]  ;;  %v42_v6 = vld [vmem:[#allocation6] sm:$0xff]  ;;  %v41_v7 = vld [vmem:[#allocation3] sm:$0xff]  ;;  %s322_s25 = smov [#allocation8]  }
  0x1f   :  { %233 = vmatpush3.msra.mxu0 %v45_v2  ;;  %v61_v4 = vand.u32 127, %v60_v1  ;;  %v226_v9 = vld [vmem:[%s357_s2] ss:$0 sm:$0xff]  ;;  %s215_s26 = sshll.u32 %s322_s25, 4  ;;  %s216_s26 = int_to_ptr.vmem [resolvable:$true] %s215_s26 }
  0x20   :  { %234 = vmatprep.subr.mxu0 %v320_v0  ;;  %s290_s27 = scalar_lea.vmem %s216_s26, 128  ;;  %p295_p11 = scmp.lt.s32.totalorder %s216_s26, %s216_s26 }
  0x21   :  { %235 = vmatpush3.msra.mxu0 %v44_v3  ;;  %vm63_vm1 = vcmp.lt.s32.totalorder %v61_v4, 32  ;;  %p291_p10 = scmp.ne.s32.totalorder %s216_s26, %s290_s27  ;;  %p296_p12 = scmp.lt.s32.totalorder %s290_s27, %s290_s27 }
  0x22   :  { %236 = vmatprep.subr.mxu0 %v320_v0 }
  0x23   :  { %237 = vmatpush3.msra.mxu0 %v43_v5  ;;  %p297_p13 = por %p296_p12, %p295_p11 }
  0x24   :  { %238 = vmatprep.subr.mxu0 %v320_v0 }
  0x25   :  { %239 = vmatpush3.msra.mxu0 %v42_v6  ;;  %p298_p0 = pnand %p297_p13, %p291_p10 }
  0x26   :  { %241 = vmatmul.mubr.msk.f32.vlgmr.msra.gmra.mxu0 %vm63_vm1, %v41_v7 }
  0xe6   :  { %v180_v8 = vpop.f32.mrf.mxu0 }
  0xe7   :  { %v199_v10 = vmul.f32 0.17677669, %v180_v8 }
  0xe8   :  { %v242_v11 = vpop.f32.mrf.mxu0 }
  0xe9   :  { %v207_v12 = vadd.f32 %v226_v9, %v199_v10 }
  0xeb   :  { %208 = vst [vmem:[#allocation8] sm:$0xff] %v207_v12 }
  0xec   :  { %301 = shalt.err (!%p298_p0)
}
  0xed   :  { %218 = dma.vmem_to_hbm [thread:$0]  %s216_s26, 128, %s358_s3, [#allocation5]  }
  0xee   :  { %314 = dma.done.wait [#allocation5], 128  }
  0xef   :  { %315 = vsyncadd [#allocation5], 4294967168 }
  0xf0   :  { %222 = vsyncpa [#allocation4], 1 }
  0xf1   :  { %223 = vsyncpa [#allocation7], 1 }
  0xf2   :  { %224 = vsyncpa [#allocation5], 1 }

</bundles_post_ra>
